<compile_context>
chip_gen: v7x
topology: tpu7x:2x2x1
jax: 0.10.0
libtpu: 0.0.40
codegen_flags: <defaults>
</compile_context>

<pallas_src>
import math
import jax
import jax.numpy as jnp
from jax.experimental import pallas as pl
from jax.experimental.pallas import tpu as pltpu


def _round_up(n, m):
    return ((n + m - 1) // m) * m


# ----------------------------------------------------------------------------
# Pallas kernels
# ----------------------------------------------------------------------------

def _pattern_mlp_kernel(x_ref, w1_ref, b1_ref, w2_ref, b2_ref, w3_ref, b3_ref,
                        w4_ref, b4_ref, o_ref):
    """Conv2d((1,3)) + 3x Conv2d((1,1)) encoder as a column-major MLP.

    Shapes (per grid step, tn = lane-dense column tile, positions = (b,n,d)):
      x:  (F, tn)    features F = C*3 on sublanes, positions on lanes
      w1: (H1, F)  b1: (H1, 1)    -- f32, layer 1 on the VPU (K = F = 6)
      w2: (H2, H1) b2: (H2, 1)    -- w2/w3 bf16, single 2-D MXU matmul each,
      w3: (H3, H2) b3: (H3, 1)       f32 accumulation; bias+ReLU stay f32
      w4: (H3, 1)  b4: (1, 1)     -- single output channel, VPU mul + reduce
      o:  (1, tn)                 -- lane-dense output block
    """
    x = x_ref[...]                                       # (F, tn) f32
    F = x.shape[0]

    # ---- layer 1: K = F = 6 broadcast FMAs on the VPU, bias folded in.
    h = x[0:1, :] * w1_ref[:, 0:1] + b1_ref[...]         # (H1, tn)
    for k in range(1, F):                                # F tiny & static
        h = h + x[k:k + 1, :] * w1_ref[:, k:k + 1]
    h = jnp.maximum(h, 0.0)

    # ---- layer 2: (H2, H1) @ (H1, tn) bf16 MXU matmul, f32 accumulate.
    h = jnp.dot(w2_ref[...], h.astype(jnp.bfloat16),
                preferred_element_type=jnp.float32)      # (H2, tn)
    h = jnp.maximum(h + b2_ref[...], 0.0)

    # ---- layer 3: (H3, H2) @ (H2, tn) bf16 MXU matmul.
    h = jnp.dot(w3_ref[...], h.astype(jnp.bfloat16),
                preferred_element_type=jnp.float32)      # (H3, tn)
    h = jnp.maximum(h + b3_ref[...], 0.0)

    # ---- layer 4: one output channel -> multiply + sublane reduce.
    o_ref[...] = jnp.sum(h * w4_ref[...], axis=0, keepdims=True) + b4_ref[...]


def _pattern_matcher_kernel(q_ref, s_ref, o_ref):
    """scores = -||query - support||_2 ; support (B,1,D) broadcast in-kernel."""
    d = q_ref[...] - s_ref[...]                          # (B, NQ, D)
    o_ref[...] = -jnp.sqrt(jnp.sum(d * d, axis=-1))      # (B, NQ)


def _pattern_matcher_pair_kernel(q_ref, sp_ref, sn_ref, op_ref, on_ref):
    """Fused pos/neg prototype matcher: one launch, one grid step, two outputs."""
    q = q_ref[...]
    dp = q - sp_ref[...]
    dn = q - sn_ref[...]
    op_ref[...] = -jnp.sqrt(jnp.sum(dp * dp, axis=-1))
    on_ref[...] = -jnp.sqrt(jnp.sum(dn * dn, axis=-1))


# ----------------------------------------------------------------------------
# Wrappers
# ----------------------------------------------------------------------------

def pattern_learner(x, params, tn_target=512):
    """x: (B, N, C, 3, D) float32 -> (B, N, D) float32."""
    B, N, C, S, D = x.shape
    F = C * S
    M = B * N
    Ntot = M * D
    w1, b1, w2, b2, w3, b3, w4, b4 = params

    # Kernel-friendly weight orientation (channels on sublanes); tiny, done once
    # in XLA outside the kernel.  w2/w3 pre-cast to bf16 for the MXU.
    w1t = w1.T                                  # (H1, F)
    b1c = b1.reshape(-1, 1)                     # (H1, 1)
    w2t = w2.T.astype(jnp.bfloat16)             # (H2, H1)
    b2c = b2.reshape(-1, 1)                     # (H2, 1)
    w3t = w3.T.astype(jnp.bfloat16)             # (H3, H2)
    b3c = b3.reshape(-1, 1)                     # (H3, 1)
    w4c = w4.reshape(-1, 1)                     # (H3, 1)
    b4c = b4.reshape(1, 1)                      # (1, 1)

    # Columnize: (M, F, D) -> (F, M*D).  Positions (b, n, d) go on the lane
    # axis; the small XLA transpose is negligible vs the ~800 flop/byte MLP.
    xcols = jnp.transpose(x.reshape(M, F, D), (1, 0, 2)).reshape(F, Ntot)

    # Lane-dense position tile: multiple of 256 (MXU N on v6e/v7x), and >= 2
    # grid steps when there is enough work so both v7x TensorCores get used.
    half = _round_up(max(1, -(-Ntot // 2)), 256)
    tn = max(256, min(_round_up(tn_target, 256), half))
    Ntot_p = _round_up(Ntot, tn)
    if Ntot_p != Ntot:
        xcols = jnp.pad(xcols, ((0, 0), (0, Ntot_p - Ntot)))

    weights = (w1t, b1c, w2t, b2c, w3t, b3c, w4c, b4c)
    out = pl.pallas_call(
        _pattern_mlp_kernel,
        out_shape=jax.ShapeDtypeStruct((1, Ntot_p), jnp.float32),
        grid=(Ntot_p // tn,),
        in_specs=[pl.BlockSpec((F, tn), lambda i: (0, i))]
        + [pl.BlockSpec(w.shape, lambda i: (0, 0)) for w in weights],
        out_specs=pl.BlockSpec((1, tn), lambda i: (0, i)),
        compiler_params=pltpu.CompilerParams(
            dimension_semantics=("parallel",),
            vmem_limit_bytes=32 * 1024 * 1024),
    )(xcols, *weights)
    return out[0, :Ntot].reshape(B, N, D)


def pattern_matcher(query, support):
    """The spec module. query: (B, NQ, D), support: (B, 1, D) -> (B, NQ)."""
    B, NQ, D = query.shape
    assert support.shape[1] == 1 or support.shape[1] == NQ, "support must broadcast"
    out = pl.pallas_call(
        _pattern_matcher_kernel,
        out_shape=jax.ShapeDtypeStruct((B, NQ), jnp.float32),
        grid=(1,),
        in_specs=[pl.BlockSpec((B, NQ, D), lambda i: (0, 0, 0)),
                  pl.BlockSpec(support.shape, lambda i: (0, 0, 0))],
        out_specs=pl.BlockSpec((B, NQ), lambda i: (0, 0)),
    )(query, support)
    return out


def pattern_matcher_pair(query, support_pos, support_neg):
    """Fused pos/neg matcher. query: (B, NQ, D), supports: (B, 1, D)."""
    B, NQ, D = query.shape
    assert support_pos.shape[1] == 1 and support_neg.shape[1] == 1
    op, on = pl.pallas_call(
        _pattern_matcher_pair_kernel,
        out_shape=(jax.ShapeDtypeStruct((B, NQ), jnp.float32),
                   jax.ShapeDtypeStruct((B, NQ), jnp.float32)),
        grid=(1,),
        in_specs=[pl.BlockSpec((B, NQ, D), lambda i: (0, 0, 0)),
                  pl.BlockSpec(support_pos.shape, lambda i: (0, 0, 0)),
                  pl.BlockSpec(support_neg.shape, lambda i: (0, 0, 0))],
        out_specs=(pl.BlockSpec((B, NQ), lambda i: (0, 0)),
                   pl.BlockSpec((B, NQ), lambda i: (0, 0))),
    )(query, support_pos, support_neg)
    return op, on


# ----------------------------------------------------------------------------
# MetaP glue (plain JAX)
# ----------------------------------------------------------------------------

def get_relation(pairs, mean=False):
    """pairs: (B, N, C, 2, D) -> relation = tail - head, optionally mean over N."""
    rel = (pairs[:, :, :, 1, :] - pairs[:, :, :, 0, :])[:, :, :, None, :]
    if mean:
        rel = jnp.mean(rel, axis=1, keepdims=True)
    return rel


def concat_relation(pairs, relation):
    if relation.shape[1] != pairs.shape[1]:
        relation = jnp.broadcast_to(
            relation, (relation.shape[0], pairs.shape[1]) + relation.shape[2:])
    triplet = jnp.concatenate([relation, pairs], axis=-2)   # (B,N,C,3,D)
    return triplet[:, :, :, jnp.array([1, 0, 2]), :]        # (head, rel, tail)


def metap_forward(support, support_negative, query, negative, params,
                  learner_fn, matcher_pair_fn, *, beta=5.0, margin=1.0, vbm=True):
    few = support.shape[1]
    num_sn = support_negative.shape[1]
    num_q = query.shape[1]

    pos_relation = get_relation(support, mean=True)
    support_t = concat_relation(support, pos_relation)
    support_negative_t = concat_relation(support_negative, pos_relation)
    query_t = concat_relation(query, pos_relation)
    negative_t = concat_relation(negative, pos_relation)

    # Rows are independent in the encoder -> single learner launch for all triples.
    all_t = jnp.concatenate(
        [support_t, support_negative_t, query_t, negative_t], axis=1)
    enc = learner_fn(all_t, params)                 # (B, few+num_sn+num_q+num_n, D)
    spt_pos = enc[:, :few]
    spt_neg = enc[:, few:few + num_sn]
    qry = enc[:, few + num_sn:]                     # (B, num_q + num_n, D)

    # aggregator == 'max'
    spt_pos_a = jnp.max(spt_pos, axis=1, keepdims=True)
    spt_neg_a = jnp.max(spt_neg, axis=1, keepdims=True)

    # One fused matcher launch for the pos & neg prototypes.
    qry_spt_pos_score, qry_spt_neg_score = matcher_pair_fn(qry, spt_pos_a, spt_neg_a)

    # pos/neg query scores are slices of the scores above (no extra launches).
    pos_score = qry_spt_pos_score[:, :num_q]
    neg_score = qry_spt_neg_score[:, :num_q]
    pos_ = jnp.mean(jnp.mean(pos_score, axis=1), axis=0)
    neg_ = jnp.mean(jnp.mean(neg_score, axis=1), axis=0)
    delta_loss = jnp.maximum(0.0, pos_ - neg_ + margin)

    score = jnp.stack([qry_spt_pos_score, qry_spt_neg_score], axis=-1)
    y_query = jnp.ones((score.shape[0], score.shape[1]), dtype=jnp.int32)
    y_query = y_query.at[:, :num_q].set(0)

    if vbm:
        delta = qry_spt_pos_score - beta * qry_spt_neg_score
    else:
        delta = qry_spt_pos_score
    p_score = delta[:, :num_q]
    n_score = delta[:, num_q:]
    return score.reshape(-1, 2), y_query.reshape(-1), p_score, n_score, delta_loss


# ----------------------------------------------------------------------------
# Deterministic parameter init (PatternLearner encoder, kaiming-normal weights)
# ----------------------------------------------------------------------------

def init_pattern_learner_params(key, input_channels):
    dims = [input_channels * 3, 128, 64, 32, 1]   # (C*kw, 128, 64, 32, 1)
    ks = jax.random.split(key, 8)

    def kaiming(k, fan_in, shape):
        return (jax.random.normal(k, shape) * math.sqrt(2.0 / fan_in)).astype(jnp.float32)

    def bias(k, fan_in, shape):
        bound = 1.0 / math.sqrt(fan_in)
        return jax.random.uniform(k, shape, minval=-bound, maxval=bound,
                                  dtype=jnp.float32)

    w1 = kaiming(ks[0], dims[0], (dims[0], dims[1]))
    b1 = bias(ks[1], dims[0], (1, dims[1]))
    w2 = kaiming(ks[2], dims[1], (dims[1], dims[2]))
    b2 = bias(ks[3], dims[1], (1, dims[2]))
    w3 = kaiming(ks[4], dims[2], (dims[2], dims[3]))
    b3 = bias(ks[5], dims[2], (1, dims[3]))
    w4 = kaiming(ks[6], dims[3], (1, dims[3]))    # stored transposed (1, 32)
    b4 = bias(ks[7], dims[3], (1, 1))
    return (w1, b1, w2, b2, w3, b3, w4, b4)


# ----------------------------------------------------------------------------
# Pure-JAX references (same bf16 matmul casts as the kernel) for self-check
# ----------------------------------------------------------------------------

def ref_pattern_learner(x, params):
    B, N, C, S, D = x.shape
    w1, b1, w2, b2, w3, b3, w4, b4 = params
    rows = jnp.transpose(x, (0, 1, 4, 2, 3)).reshape(B * N * D, C * S)
    h = jnp.maximum(jnp.dot(rows, w1, precision="highest") + b1, 0.0)
    h = jnp.maximum(jnp.dot(h.astype(jnp.bfloat16), w2.astype(jnp.bfloat16),
                            preferred_element_type=jnp.float32) + b2, 0.0)
    h = jnp.maximum(jnp.dot(h.astype(jnp.bfloat16), w3.astype(jnp.bfloat16),
                            preferred_element_type=jnp.float32) + b3, 0.0)
    o = jnp.dot(h, w4.T, precision="highest") + b4
    return o[:, 0].reshape(B, N, D)


def ref_pattern_matcher(query, support):
    support = jnp.broadcast_to(support, query.shape)
    return -jnp.sqrt(jnp.sum((query - support) ** 2, axis=-1))


def ref_pattern_matcher_pair(query, support_pos, support_neg):
    return (ref_pattern_matcher(query, support_pos),
            ref_pattern_matcher(query, support_neg))


# ----------------------------------------------------------------------------
# Main
# ----------------------------------------------------------------------------

if __name__ == "__main__":
    B, C, D = 2, 2, 32          # relation-batch, channels (rum=True), embed_dim
    few, num_sn, num_q, num_n = 3, 3, 4, 4

    key = jax.random.PRNGKey(0)
    k_par, k_s, k_sn, k_q, k_n, k_dq, k_ds = jax.random.split(key, 7)
    params = init_pattern_learner_params(k_par, input_channels=C)

    # pre-embedded (B, N, C, 2, D) pairs (head, tail embeddings)
    support = jax.random.normal(k_s, (B, few, C, 2, D), dtype=jnp.float32)
    support_negative = jax.random.normal(k_sn, (B, num_sn, C, 2, D), dtype=jnp.float32)
    query = jax.random.normal(k_q, (B, num_q, C, 2, D), dtype=jnp.float32)
    negative = jax.random.normal(k_n, (B, num_n, C, 2, D), dtype=jnp.float32)

    # ---- 1) the spec module on its own: PatternMatcher ----
    q_demo = jax.random.normal(k_dq, (B, num_q, D), dtype=jnp.float32)
    s_demo = jax.random.normal(k_ds, (B, 1, D), dtype=jnp.float32)
    scores = jax.block_until_ready(pattern_matcher(q_demo, s_demo))
    assert scores.shape == (B, num_q)
    assert jnp.allclose(scores, ref_pattern_matcher(q_demo, s_demo),
                        atol=1e-4, rtol=1e-4), "PatternMatcher mismatch"

    # ---- 2) full MetaP forward (Pallas learner + fused Pallas matcher) ----
    outs = metap_forward(support, support_negative, query, negative, params,
                         pattern_learner, pattern_matcher_pair,
                         beta=5.0, margin=1.0, vbm=True)
    outs = jax.block_until_ready(outs)

    ref = metap_forward(support, support_negative, query, negative, params,
                        ref_pattern_learner, ref_pattern_matcher_pair,
                        beta=5.0, margin=1.0, vbm=True)
    ref = jax.block_until_ready(ref)

    for got, want in zip(outs, ref):
        assert got.shape == want.shape, (got.shape, want.shape)
        assert jnp.allclose(got.astype(jnp.float32), want.astype(jnp.float32),
                            atol=2e-3, rtol=2e-3), "mismatch vs reference"

    score, y_query, p_score, n_score, delta_loss = outs
    assert score.shape == (B * (num_q + num_n), 2)
    assert y_query.shape == (B * (num_q + num_n),)
    assert p_score.shape == (B, num_q) and n_score.shape == (B, num_n)
    print("KERNEL_OK")
</pallas_src>

<mosaic_0001>
module attributes {stable_mosaic.version = 11 : i64} {
  func.func @_pattern_matcher_kernel(%arg0: i32, %arg1: memref<2x4x32xf32, #tpu.memory_space<vmem>>, %arg2: memref<2x1x32xf32, #tpu.memory_space<vmem>>, %arg3: memref<2x4xf32, #tpu.memory_space<vmem>>) attributes {dimension_semantics = [#tpu.dimension_semantics<arbitrary>], iteration_bounds = array<i64: 1>, scalar_prefetch = 0 : i64, scratch_operands = 0 : i64, tpu.core_type = #tpu.core_type<tc>, window_params = [{pipeline_mode = #tpu.pipeline_mode<synchronous>, transform_indices = @transform_0, window_bounds = array<i64: 2, 4, 32>}, {pipeline_mode = #tpu.pipeline_mode<synchronous>, transform_indices = @transform_1, window_bounds = array<i64: 2, 1, 32>}, {pipeline_mode = #tpu.pipeline_mode<synchronous>, transform_indices = @transform_2, window_bounds = array<i64: 2, 4>}]} {
    %c0 = arith.constant 0 : index
    %c0_0 = arith.constant 0 : index
    %c0_1 = arith.constant 0 : index
    %0 = vector.load %arg1[%c0, %c0_0, %c0_1] : memref<2x4x32xf32, #tpu.memory_space<vmem>>, vector<2x4x32xf32>
    %c0_2 = arith.constant 0 : index
    %c0_3 = arith.constant 0 : index
    %c0_4 = arith.constant 0 : index
    %1 = vector.load %arg2[%c0_2, %c0_3, %c0_4] : memref<2x1x32xf32, #tpu.memory_space<vmem>>, vector<2x1x32xf32>
    %2 = vector.broadcast %1 : vector<2x1x32xf32> to vector<2x4x32xf32>
    %3 = arith.subf %0, %2 : vector<2x4x32xf32>
    %4 = arith.mulf %3, %3 : vector<2x4x32xf32>
    %cst = arith.constant dense<0.000000e+00> : vector<2x4xf32>
    %5 = vector.multi_reduction <add>, %4, %cst [2] : vector<2x4x32xf32> to vector<2x4xf32>
    %6 = math.sqrt %5 : vector<2x4xf32>
    %cst_5 = arith.constant 0.000000e+00 : f32
    %7 = vector.broadcast %cst_5 : f32 to vector<2x4xf32>
    %8 = arith.subf %7, %6 : vector<2x4xf32>
    %c0_6 = arith.constant 0 : index
    %c0_7 = arith.constant 0 : index
    %9 = vector.load %arg3[%c0_6, %c0_7] : memref<2x4xf32, #tpu.memory_space<vmem>>, vector<2x4xf32>
    tpu.vector_store %arg3[%c0_6, %c0_7], %8 {strides = array<i32>} : memref<2x4xf32, #tpu.memory_space<vmem>>, vector<2x4xf32>,
    return
  }
  func.func @transform_0(%arg0: i32) -> (i32, i32, i32) {
    %c0_i32 = arith.constant 0 : i32
    %c0_i32_0 = arith.constant 0 : i32
    %c0_i32_1 = arith.constant 0 : i32
    %c0_i32_2 = arith.constant 0 : i32
    return %c0_i32, %c0_i32_0, %c0_i32_1 : i32, i32, i32
  }
  func.func @transform_1(%arg0: i32) -> (i32, i32, i32) {
    %c0_i32 = arith.constant 0 : i32
    %c0_i32_0 = arith.constant 0 : i32
    %c0_i32_1 = arith.constant 0 : i32
    %c0_i32_2 = arith.constant 0 : i32
    return %c0_i32, %c0_i32_0, %c0_i32_1 : i32, i32, i32
  }
  func.func @transform_2(%arg0: i32) -> (i32, i32) {
    %c0_i32 = arith.constant 0 : i32
    %c0_i32_0 = arith.constant 0 : i32
    %c0_i32_1 = arith.constant 0 : i32
    return %c0_i32, %c0_i32_0 : i32, i32
  }
}

</mosaic_0001>

<bundles_post_ra>
// kernel: tpu_custom_call.1
= control target key start
LH: loop header
LB: loop body
LE: loop exit
PB: predicated region body
PF: predicated region fallthrough
CT: control target
= control target key end

     0   :  { %7 = vsyncpa [#allocation3], 0  ;;  %s208_s0 = inlined_call_operand.hbm [shape: f32[2,4,32], index: 0, kind: input, shape index: {}]   ;;  %s209_s1 = inlined_call_operand.vmem [shape: f32[2,1,32], index: 1, kind: input, shape index: {}]   ;;  %s210_s2 = inlined_call_operand.hbm [shape: f32[2,4], index: 2, kind: output, shape index: {}]  }
   0x1   :  { %8 = vsyncpa [#allocation4], 0  ;;  %s159_s9 = smov [#allocation2]   ;;  %s111_s13 = scalar_lea.hbm %s208_s0, 128 }
   0x2   :  { %s14_s10 = sshll.u32 %s159_s9, 4  ;;  %p112_p0 = scmp.ne.s32.totalorder %s208_s0, %s111_s13  ;;  %s15_s10 = int_to_ptr.vmem [resolvable:$true] %s14_s10 }
   0x3   :  { %p115_p1 = scmp.lt.u32.totalorder %s111_s13, %s208_s0 }
   0x5   :  { %p117_p2 = pnand %p115_p1, %p112_p0 }
   0x7   :  { %120 = shalt.err (!%p117_p2)
}
   0x8   :  { %s121_s18 = scalar_lea.vmem %s15_s10, 128  ;;  %p126_p4 = scmp.lt.s32.totalorder %s15_s10, %s15_s10 }
   0x9   :  { %p122_p3 = scmp.ne.s32.totalorder %s15_s10, %s121_s18  ;;  %p127_p5 = scmp.lt.s32.totalorder %s121_s18, %s121_s18 }
   0xb   :  { %p128_p6 = por %p127_p5, %p126_p4 }
   0xd   :  { %p129_p7 = pnand %p128_p6, %p122_p3 }
   0xf   :  { %132 = shalt.err (!%p129_p7)
}
  0x10   :  { %s160_s19 = smov 64   ;;  %s161_s20 = smov 4  }
  0x11   :  { %20 = dma.hbm_to_vmem [thread:$0]  %s208_s0, 128, %s15_s10, [#allocation3], %s160_s19, %s160_s19, %s161_s20  }
  0x12   :  { %155 = dma.done.wait [#allocation3], 128  }
  0x13   :  { %156 = vsyncadd [#allocation3], 4294967168  ;;  %v26_v0 = vld [vmem:[#allocation2] sm:$0xf]  ;;  %v27_v2 = vld [vmem:[#allocation2 + $0x4] sm:$0xf]  ;;  %v71_v12 = vlaneseq }
  0x14   :  { %v101_v1 = vld [vmem:[%s209_s1] ss:$0 sm:$0xff]  ;;  %v102_v4 = vld [vmem:[%s209_s1 + $0x1] ss:$0 sm:$0xff]  ;;  %vm46_vm0 = vcmask 257024   ;;  %s162_s0 = smov [#allocation5]  }
  0x15   :  { %v42_v3 = vsub.f32 %v26_v0, %v101_v1  ;;  %v43_v5 = vsub.f32 %v27_v2, %v102_v4  ;;  %v72_v17 = vand.u32 127, %v71_v12  ;;  %v74_v18 = vshrl.u32 %v71_v12, 7  ;;  %s92_s1 = sshll.u32 %s162_s0, 4  ;;  %s93_s1 = int_to_ptr.vmem [resolvable:$true] %s92_s1 }
  0x16   :  { %vm81_vm5 = vcmask 1041409   ;;  %vm84_vm6 = vcmask 25600   ;;  %s133_s27 = scalar_lea.vmem %s93_s1, 32  ;;  %p138_p9 = scmp.lt.s32.totalorder %s93_s1, %s93_s1 }
  0x17   :  { %v44_v6 = vmul.f32 %v42_v3, %v42_v3  ;;  %v45_v7 = vmul.f32 %v43_v5, %v43_v5  ;;  %v75_v25 = vsub.s32 %v72_v17, %v74_v18  ;;  %p134_p8 = scmp.ne.s32.totalorder %s93_s1, %s133_s27  ;;  %p139_p10 = scmp.lt.s32.totalorder %s133_s27, %s133_s27 }
  0x19   :  { %v47_v8 = vsel %vm46_vm0, %v44_v6, 0.0  ;;  %v50_v9 = vsel %vm46_vm0, %v45_v7, 0.0  ;;  %p140_p11 = por %p139_p10, %p138_p9 }
  0x1a   :  { %48 = vadd.xlane.f32.xlu0 %v47_v8 }
  0x1b   :  { %p141_p12 = pnand %p140_p11, %p134_p8 }
  0x1e   :  { %51 = vadd.xlane.f32.xlu0 %v50_v9 }
  0xa7   :  { %v49_v10 = vpop.xlane.xlu0 %48 }
  0xa8   :  { %107 = vrsqrt.f32 %v49_v10  ;;  %vm55_vm1 = vcmp.eq.f32.partialorder %v49_v10, inf  ;;  %v58_v15 = vand.u32 2147483648, %v49_v10  ;;  %vm57_vm2 = vcmp.eq.f32.partialorder %v49_v10, 0.0 }
  0xab   :  { %v52_v11 = vpop.xlane.xlu0 %51 }
  0xac   :  { %109 = vrsqrt.f32 %v52_v11  ;;  %vm62_vm3 = vcmp.eq.f32.partialorder %v52_v11, inf  ;;  %v65_v22 = vand.u32 2147483648, %v52_v11  ;;  %vm64_vm4 = vcmp.eq.f32.partialorder %v52_v11, 0.0 }
  0xb2   :  { %v108_v13 = vpop.eup %107 }
  0xb3   :  { %v54_v14 = vmul.f32 %v108_v13, %v49_v10 }
  0xb5   :  { %v56_v16 = vsel %vm55_vm1, %v49_v10, %v54_v14 }
  0xb6   :  { %v110_v19 = vpop.eup %109  ;;  %v59_v20 = vsel %vm57_vm2, %v58_v15, %v56_v16 }
  0xb7   :  { %v61_v21 = vmul.f32 %v110_v19, %v52_v11  ;;  %v67_v24 = vsub.f32 0.0, %v59_v20 }
  0xb9   :  { %v63_v23 = vsel %vm62_vm3, %v52_v11, %v61_v21  ;;  %v76_v28 = vrot.slane %v67_v24, %v75_v25 }
  0xba   :  { %v66_v26 = vsel %vm64_vm4, %v65_v22, %v63_v23 }
  0xbb   :  { %v68_v27 = vsub.f32 0.0, %v66_v26 }
  0xbd   :  { %v80_v29 = vrot.slane %v68_v27, %v75_v25 }
  0xbf   :  { %v82_v30 = vsel %vm81_vm5, %v80_v29, %v76_v28 }
  0xc0   :  { %85 = vst.msk [vmem:[#allocation5] sm:$0x3] %vm84_vm6, %v82_v30 }
  0xc1   :  { %144 = shalt.err (!%p141_p12)
}
  0xc2   :  { %s145_s30 = scalar_lea.hbm %s210_s2, 32 }
  0xc3   :  { %p146_p13 = scmp.ne.s32.totalorder %s210_s2, %s145_s30  ;;  %p149_p0 = scmp.lt.u32.totalorder %s145_s30, %s210_s2 }
  0xc5   :  { %p151_p1 = pnand %p149_p0, %p146_p13 }
  0xc7   :  { %154 = shalt.err (!%p151_p1)
}
  0xc8   :  { %95 = dma.vmem_to_hbm [thread:$0]  %s93_s1, 32, %s210_s2, [#allocation4]  }
  0xc9   :  { %157 = dma.done.wait [#allocation4], 32  }
  0xca   :  { %158 = vsyncadd [#allocation4], 4294967264 }
  0xcb   :  { %99 = vsyncpa [#allocation3], 1 }
  0xcc   :  { %100 = vsyncpa [#allocation4], 1 }

</bundles_post_ra>
